<compile_context>
chip_gen: v7x
topology: tpu7x:2x2x1
jax: 0.10.0
libtpu: 0.0.40
codegen_flags: <defaults>
</compile_context>

<pallas_src>
import jax
import jax.numpy as jnp
from jax import lax
from jax.experimental import pallas as pl
from jax.experimental.pallas import tpu as pltpu


_VMEM_LIMIT = 8 * 1024 * 1024          # tightened explicit scoped-VMEM request

# conv-tap / pool-window offsets on the 8-wide pooled grid: s = ki*8 + kj
_SHIFTS = tuple(ki * 8 + kj for ki in range(3) for kj in range(3))


# ----------------------------- fused Pallas kernel --------------------------

def fused_forward(p1t, w1t, sh1, w2t, sh2, selt, w1p, b1, wf2, bf2, *, batch):
    """conv1+BN+ReLU+pool -> conv2+BN+ReLU+pool -> flatten -> fc1+ReLU ->
    fc2 -> logsoftmax, all in one pallas_call.

    p1t : (9, 9*B*64)  lane-dense fused conv1/pool1 im2col
    Returns (B, 128) log-probs; lanes >= 10 are -1e30 padding.
    """
    nb = batch * 64                    # pooled block-1 positions per pool offset
    w2l = nb - 18                      # conv2 output lanes actually needed
    wml = nb - 36                      # pooled block-2 lanes actually needed
    hdim = w1p.shape[1]                # 256
    dpad = wf2.shape[1]                # 128 (lane-dense padded head)

    def kernel(p1_ref, w1_ref, sh1_ref, w2_ref, sh2_ref, sel_ref,
               w1p_ref, b1_ref, wf2_ref, bf2_ref, o_ref):
        # ---- Conv2d(1,32,3) + BN(shift) + ReLU over all 9 pool offsets: 1 matmul
        z1 = jnp.dot(w1_ref[...], p1_ref[...],
                     preferred_element_type=jnp.float32)              # (32, 9*nb)
        z1 = jnp.maximum(z1 + sh1_ref[...], 0.0)

        # ---- MaxPool2d(3): max over the 9 pool offsets (lane-aligned at B=2)
        y1 = z1[:, 0:nb]
        for p in range(1, 9):
            y1 = jnp.maximum(y1, z1[:, p * nb:(p + 1) * nb])          # (32, nb)

        # ---- Conv2d(32,32,3): in-register im2col = 9 lane-shifted slices of
        # y1 stacked on the contraction axis; only the valid 6x6 region
        # (first w2l lanes) is kept so every slice stays in-bounds.
        p2 = jnp.concatenate([y1[:, s:s + w2l] for s in _SHIFTS], axis=0)  # (288, w2l)
        z2 = jnp.dot(w2_ref[...], p2,
                     preferred_element_type=jnp.float32)              # (32, w2l)
        z2 = jnp.maximum(z2 + sh2_ref[...], 0.0)

        # ---- MaxPool2d(3) on the 6x6 grid: max over 9 lane shifts.
        m = z2[:, 0:wml]
        for s in _SHIFTS[1:]:
            m = jnp.maximum(m, z2[:, s:s + wml])                      # (32, wml)

        # ---- Gather the B*4 pooled (2x2) positions with a 0/1 selection
        # matmul contracting the lane axis -> rows ordered (s, b).
        y2t = lax.dot_general(sel_ref[...], m,
                              dimension_numbers=(((1,), (1,)), ((), ())),
                              preferred_element_type=jnp.float32)     # (4B, 32)

        # ---- Flatten (NCHW order folded into w1p): (B, 128), col = s*32 + c
        feat = jnp.concatenate(
            [y2t[s * batch:(s + 1) * batch, :] for s in range(4)], axis=1)

        # ---- Linear(128,256) + ReLU + Linear(256,10->128pad) + LogSoftmax(1)
        h = jnp.maximum(
            jnp.dot(feat, w1p_ref[...], preferred_element_type=jnp.float32)
            + b1_ref[...], 0.0)                                       # (B, 256)
        zz = jnp.dot(h, wf2_ref[...],
                     preferred_element_type=jnp.float32) + bf2_ref[...]
        mx = jnp.max(zz, axis=-1, keepdims=True)
        lse = jnp.log(jnp.sum(jnp.exp(zz - mx), axis=-1, keepdims=True)) + mx
        o_ref[...] = zz - lse                                         # (B, 128)

    def spec(a):
        return pl.BlockSpec(a.shape, lambda i: (0, 0))

    return pl.pallas_call(
        kernel,
        out_shape=jax.ShapeDtypeStruct((batch, dpad), jnp.float32),
        grid_spec=pltpu.PrefetchScalarGridSpec(
            num_scalar_prefetch=0,
            grid=(1,),
            in_specs=[spec(p1t), spec(w1t), spec(sh1), spec(w2t), spec(sh2),
                      spec(selt), spec(w1p), spec(b1), spec(wf2), spec(bf2)],
            out_specs=pl.BlockSpec((batch, dpad), lambda i: (0, 0)),
        ),
        compiler_params=pltpu.CompilerParams(
            dimension_semantics=("arbitrary",),
            vmem_limit_bytes=_VMEM_LIMIT),
    )(p1t, w1t, sh1, w2t, sh2, selt, w1p, b1, wf2, bf2)


# ------------------------------ JAX glue ------------------------------------

def _conv1_pool_patches(x):
    """Fused conv3x3 + maxpool3/3 im2col for Cin=1, lane-dense layout.

    x: (B, 28, 28) -> (9, 9*B*64).  Row k = conv tap (ki*3+kj);
    lane = p1*(B*64) + b*64 + u*8 + v, p1 = pool offset, (u,v) pooled position.
    """
    b = x.shape[0]
    taps = jnp.stack([x[:, ki:ki + 26, kj:kj + 26]
                      for ki in range(3) for kj in range(3)], axis=0)   # (9,B,26,26)
    offs = jnp.stack([taps[:, :, di:di + 24:3, dj:dj + 24:3]
                      for di in range(3) for dj in range(3)], axis=1)   # (9,9,B,8,8)
    return offs.reshape(9, 9 * b * 64)


def _pool2_selection(batch):
    """0/1 selection matrix (4*batch, batch*64 - 36): row s*batch + b picks the
    lane of pooled 2x2 output position s = ph*2 + pw of image b."""
    wml = batch * 64 - 36
    lanes = jnp.array([b * 64 + 24 * (s // 2) + 3 * (s % 2)
                       for s in range(4) for b in range(batch)], jnp.int32)
    return jax.nn.one_hot(lanes, wml, dtype=jnp.float32)


def simple_torch_model_forward(x_nchw, params):
    b = x_nchw.shape[0]
    x = x_nchw[:, 0, :, :].astype(jnp.float32)             # Cin = 1 -> (B, 28, 28)
    p1t = _conv1_pool_patches(x)                            # (9, 9*B*64)
    selt = _pool2_selection(b)
    out_pad = fused_forward(p1t, params["w1t"], params["sh1"],
                            params["w2t"], params["sh2"], selt,
                            params["w1p"], params["fc1_b"],
                            params["fc2_wp"], params["fc2_bp"], batch=b)
    return out_pad[:, :10]                                  # drop lane padding


def init_params(key):
    # Deterministic synthetic parameters matching the nn.Module shapes.
    # TODO(synk): BatchNorm2d is folded in inference mode (fresh-init running
    # stats mean=0, var=1); training-mode batch statistics are not computed.
    ks = jax.random.split(key, 12)
    eps = 1e-5

    # Conv2d(1, 32, 3) + BatchNorm2d(32): BN scale folded into the weights.
    w1 = jax.random.normal(ks[0], (32, 1, 3, 3), jnp.float32) * 0.1
    cb1 = jax.random.normal(ks[1], (32,), jnp.float32) * 0.1
    g1 = 1.0 + 0.1 * jax.random.normal(ks[2], (32,), jnp.float32)
    be1 = 0.1 * jax.random.normal(ks[3], (32,), jnp.float32)
    rm1, rv1 = jnp.zeros((32,), jnp.float32), jnp.ones((32,), jnp.float32)
    scale1 = g1 / jnp.sqrt(rv1 + eps)
    w1t = w1.reshape(32, 9) * scale1[:, None]               # (cout, ki*3+kj)
    sh1 = ((cb1 - rm1) * scale1 + be1).reshape(32, 1)

    # Conv2d(32, 32, 3) + BatchNorm2d(32)
    w2 = jax.random.normal(ks[4], (32, 32, 3, 3), jnp.float32) * 0.05
    cb2 = jax.random.normal(ks[5], (32,), jnp.float32) * 0.1
    g2 = 1.0 + 0.1 * jax.random.normal(ks[6], (32,), jnp.float32)
    be2 = 0.1 * jax.random.normal(ks[7], (32,), jnp.float32)
    rm2, rv2 = jnp.zeros((32,), jnp.float32), jnp.ones((32,), jnp.float32)
    scale2 = g2 / jnp.sqrt(rv2 + eps)
    w2t = (jnp.transpose(w2, (0, 2, 3, 1)).reshape(32, 288)
           * scale2[:, None])                               # (cout, (ki*3+kj)*32+cin)
    sh2 = ((cb2 - rm2) * scale2 + be2).reshape(32, 1)

    # Linear(128, 256), stored [in=c*4+s, out]; NCHW flatten permutation folded
    # into a (s*32+c, out) layout so fc1 is a single K=128 matmul.
    fc1_w = jax.random.normal(ks[8], (128, 256), jnp.float32) * 0.05
    fc1_b = (jax.random.normal(ks[9], (256,), jnp.float32) * 0.1).reshape(1, 256)
    w1p = jnp.transpose(fc1_w.reshape(32, 4, 256), (1, 0, 2)).reshape(128, 256)

    # Linear(256, 10), padded to 128 output lanes for an unmasked final store;
    # pad bias = -1e30 so it cannot affect the logsoftmax.
    fc2_w = jax.random.normal(ks[10], (256, 10), jnp.float32) * 0.05
    fc2_b = jax.random.normal(ks[11], (10,), jnp.float32) * 0.1
    fc2_wp = jnp.zeros((256, 128), jnp.float32).at[:, :10].set(fc2_w)
    fc2_bp = jnp.full((1, 128), -1e30, jnp.float32).at[0, :10].set(fc2_b)

    return dict(w1t=w1t, sh1=sh1, w2t=w2t, sh2=sh2,
                w1p=w1p, fc1_b=fc1_b, fc2_wp=fc2_wp, fc2_bp=fc2_bp)


if __name__ == "__main__":
    key = jax.random.PRNGKey(0)
    pkey, xkey = jax.random.split(key)
    params = init_params(pkey)

    # Input shape implied by Linear(128, ...): (B, 1, 28, 28) NCHW (MNIST-like).
    x = jax.random.normal(xkey, (2, 1, 28, 28), jnp.float32)

    out = jax.jit(simple_torch_model_forward)(x, params)
    out = jax.block_until_ready(out)

    assert out.shape == (2, 10), out.shape
    assert bool(jnp.all(jnp.isfinite(out)))
    # log-softmax rows must exponentiate-sum to 1 (padded lanes contribute 0)
    assert bool(jnp.allclose(jnp.sum(jnp.exp(out), axis=1), 1.0, atol=1e-3))
    print("KERNEL_OK")
</pallas_src>

<mosaic_0001>
module attributes {stable_mosaic.version = 11 : i64} {
  func.func @kernel(%arg0: i32, %arg1: memref<9x1152xf32, #tpu.memory_space<vmem>>, %arg2: memref<32x9xf32, #tpu.memory_space<vmem>>, %arg3: memref<32x1xf32, #tpu.memory_space<vmem>>, %arg4: memref<32x288xf32, #tpu.memory_space<vmem>>, %arg5: memref<32x1xf32, #tpu.memory_space<vmem>>, %arg6: memref<8x92xf32, #tpu.memory_space<vmem>>, %arg7: memref<128x256xf32, #tpu.memory_space<vmem>>, %arg8: memref<1x256xf32, #tpu.memory_space<vmem>>, %arg9: memref<256x128xf32, #tpu.memory_space<vmem>>, %arg10: memref<1x128xf32, #tpu.memory_space<vmem>>, %arg11: memref<2x128xf32, #tpu.memory_space<vmem>>) attributes {dimension_semantics = [#tpu.dimension_semantics<arbitrary>], iteration_bounds = array<i64: 1>, scalar_prefetch = 0 : i64, scratch_operands = 0 : i64, tpu.core_type = #tpu.core_type<tc>, window_params = [{pipeline_mode = #tpu.pipeline_mode<synchronous>, transform_indices = @transform_0, window_bounds = array<i64: 9, 1152>}, {pipeline_mode = #tpu.pipeline_mode<synchronous>, transform_indices = @transform_1, window_bounds = array<i64: 32, 9>}, {pipeline_mode = #tpu.pipeline_mode<synchronous>, transform_indices = @transform_2, window_bounds = array<i64: 32, 1>}, {pipeline_mode = #tpu.pipeline_mode<synchronous>, transform_indices = @transform_3, window_bounds = array<i64: 32, 288>}, {pipeline_mode = #tpu.pipeline_mode<synchronous>, transform_indices = @transform_4, window_bounds = array<i64: 32, 1>}, {pipeline_mode = #tpu.pipeline_mode<synchronous>, transform_indices = @transform_5, window_bounds = array<i64: 8, 92>}, {pipeline_mode = #tpu.pipeline_mode<synchronous>, transform_indices = @transform_6, window_bounds = array<i64: 128, 256>}, {pipeline_mode = #tpu.pipeline_mode<synchronous>, transform_indices = @transform_7, window_bounds = array<i64: 1, 256>}, {pipeline_mode = #tpu.pipeline_mode<synchronous>, transform_indices = @transform_8, window_bounds = array<i64: 256, 128>}, {pipeline_mode = #tpu.pipeline_mode<synchronous>, transform_indices = @transform_9, window_bounds = array<i64: 1, 128>}, {pipeline_mode = #tpu.pipeline_mode<synchronous>, transform_indices = @transform_10, window_bounds = array<i64: 2, 128>}]} {
    %c0 = arith.constant 0 : index
    %c0_0 = arith.constant 0 : index
    %0 = vector.load %arg2[%c0, %c0_0] : memref<32x9xf32, #tpu.memory_space<vmem>>, vector<32x9xf32>
    %c0_1 = arith.constant 0 : index
    %c0_2 = arith.constant 0 : index
    %1 = vector.load %arg1[%c0_1, %c0_2] : memref<9x1152xf32, #tpu.memory_space<vmem>>, vector<9x1152xf32>
    %cst = arith.constant dense<0.000000e+00> : vector<32x1152xf32>
    %2 = tpu.matmul %0, %1, %cst {dimension_numbers = #tpu.dot_dimension_numbers<[1], [0], [0], [1], [0, 0, 1, 1], [], []>} : vector<32x9xf32>, vector<9x1152xf32>, vector<32x1152xf32> -> vector<32x1152xf32>
    %c0_3 = arith.constant 0 : index
    %c0_4 = arith.constant 0 : index
    %3 = vector.load %arg3[%c0_3, %c0_4] : memref<32x1xf32, #tpu.memory_space<vmem>>, vector<32x1xf32>
    %4 = vector.broadcast %3 : vector<32x1xf32> to vector<32x1152xf32>
    %5 = arith.addf %2, %4 : vector<32x1152xf32>
    %cst_5 = arith.constant 0.000000e+00 : f32
    %6 = vector.broadcast %cst_5 : f32 to vector<32x1152xf32>
    %7 = arith.maximumf %5, %6 : vector<32x1152xf32>
    %8 = vector.extract_strided_slice %7 {offsets = [0, 0], sizes = [32, 128], strides = [1, 1]} : vector<32x1152xf32> to vector<32x128xf32>
    %9 = vector.extract_strided_slice %7 {offsets = [0, 128], sizes = [32, 128], strides = [1, 1]} : vector<32x1152xf32> to vector<32x128xf32>
    %10 = arith.maximumf %8, %9 : vector<32x128xf32>
    %11 = vector.extract_strided_slice %7 {offsets = [0, 256], sizes = [32, 128], strides = [1, 1]} : vector<32x1152xf32> to vector<32x128xf32>
    %12 = arith.maximumf %10, %11 : vector<32x128xf32>
    %13 = vector.extract_strided_slice %7 {offsets = [0, 384], sizes = [32, 128], strides = [1, 1]} : vector<32x1152xf32> to vector<32x128xf32>
    %14 = arith.maximumf %12, %13 : vector<32x128xf32>
    %15 = vector.extract_strided_slice %7 {offsets = [0, 512], sizes = [32, 128], strides = [1, 1]} : vector<32x1152xf32> to vector<32x128xf32>
    %16 = arith.maximumf %14, %15 : vector<32x128xf32>
    %17 = vector.extract_strided_slice %7 {offsets = [0, 640], sizes = [32, 128], strides = [1, 1]} : vector<32x1152xf32> to vector<32x128xf32>
    %18 = arith.maximumf %16, %17 : vector<32x128xf32>
    %19 = vector.extract_strided_slice %7 {offsets = [0, 768], sizes = [32, 128], strides = [1, 1]} : vector<32x1152xf32> to vector<32x128xf32>
    %20 = arith.maximumf %18, %19 : vector<32x128xf32>
    %21 = vector.extract_strided_slice %7 {offsets = [0, 896], sizes = [32, 128], strides = [1, 1]} : vector<32x1152xf32> to vector<32x128xf32>
    %22 = arith.maximumf %20, %21 : vector<32x128xf32>
    %23 = vector.extract_strided_slice %7 {offsets = [0, 1024], sizes = [32, 128], strides = [1, 1]} : vector<32x1152xf32> to vector<32x128xf32>
    %24 = arith.maximumf %22, %23 : vector<32x128xf32>
    %25 = vector.extract_strided_slice %24 {offsets = [0, 0], sizes = [32, 110], strides = [1, 1]} : vector<32x128xf32> to vector<32x110xf32>
    %26 = vector.extract_strided_slice %24 {offsets = [0, 1], sizes = [32, 110], strides = [1, 1]} : vector<32x128xf32> to vector<32x110xf32>
    %27 = vector.extract_strided_slice %24 {offsets = [0, 2], sizes = [32, 110], strides = [1, 1]} : vector<32x128xf32> to vector<32x110xf32>
    %28 = vector.extract_strided_slice %24 {offsets = [0, 8], sizes = [32, 110], strides = [1, 1]} : vector<32x128xf32> to vector<32x110xf32>
    %29 = vector.extract_strided_slice %24 {offsets = [0, 9], sizes = [32, 110], strides = [1, 1]} : vector<32x128xf32> to vector<32x110xf32>
    %30 = vector.extract_strided_slice %24 {offsets = [0, 10], sizes = [32, 110], strides = [1, 1]} : vector<32x128xf32> to vector<32x110xf32>
    %31 = vector.extract_strided_slice %24 {offsets = [0, 16], sizes = [32, 110], strides = [1, 1]} : vector<32x128xf32> to vector<32x110xf32>
    %32 = vector.extract_strided_slice %24 {offsets = [0, 17], sizes = [32, 110], strides = [1, 1]} : vector<32x128xf32> to vector<32x110xf32>
    %33 = vector.extract_strided_slice %24 {offsets = [0, 18], sizes = [32, 110], strides = [1, 1]} : vector<32x128xf32> to vector<32x110xf32>
    %34 = tpu.concatenate %25, %26, %27, %28, %29, %30, %31, %32, %33 in 0 : vector<32x110xf32>, vector<32x110xf32>, vector<32x110xf32>, vector<32x110xf32>, vector<32x110xf32>, vector<32x110xf32>, vector<32x110xf32>, vector<32x110xf32>, vector<32x110xf32> -> vector<288x110xf32>
    %c0_6 = arith.constant 0 : index
    %c0_7 = arith.constant 0 : index
    %35 = vector.load %arg4[%c0_6, %c0_7] : memref<32x288xf32, #tpu.memory_space<vmem>>, vector<32x288xf32>
    %cst_8 = arith.constant dense<0.000000e+00> : vector<32x110xf32>
    %36 = tpu.matmul %35, %34, %cst_8 {dimension_numbers = #tpu.dot_dimension_numbers<[1], [0], [0], [1], [0, 0, 1, 1], [], []>} : vector<32x288xf32>, vector<288x110xf32>, vector<32x110xf32> -> vector<32x110xf32>
    %c0_9 = arith.constant 0 : index
    %c0_10 = arith.constant 0 : index
    %37 = vector.load %arg5[%c0_9, %c0_10] : memref<32x1xf32, #tpu.memory_space<vmem>>, vector<32x1xf32>
    %38 = vector.broadcast %37 : vector<32x1xf32> to vector<32x110xf32>
    %39 = arith.addf %36, %38 : vector<32x110xf32>
    %cst_11 = arith.constant 0.000000e+00 : f32
    %40 = vector.broadcast %cst_11 : f32 to vector<32x110xf32>
    %41 = arith.maximumf %39, %40 : vector<32x110xf32>
    %42 = vector.extract_strided_slice %41 {offsets = [0, 0], sizes = [32, 92], strides = [1, 1]} : vector<32x110xf32> to vector<32x92xf32>
    %43 = vector.extract_strided_slice %41 {offsets = [0, 1], sizes = [32, 92], strides = [1, 1]} : vector<32x110xf32> to vector<32x92xf32>
    %44 = arith.maximumf %42, %43 : vector<32x92xf32>
    %45 = vector.extract_strided_slice %41 {offsets = [0, 2], sizes = [32, 92], strides = [1, 1]} : vector<32x110xf32> to vector<32x92xf32>
    %46 = arith.maximumf %44, %45 : vector<32x92xf32>
    %47 = vector.extract_strided_slice %41 {offsets = [0, 8], sizes = [32, 92], strides = [1, 1]} : vector<32x110xf32> to vector<32x92xf32>
    %48 = arith.maximumf %46, %47 : vector<32x92xf32>
    %49 = vector.extract_strided_slice %41 {offsets = [0, 9], sizes = [32, 92], strides = [1, 1]} : vector<32x110xf32> to vector<32x92xf32>
    %50 = arith.maximumf %48, %49 : vector<32x92xf32>
    %51 = vector.extract_strided_slice %41 {offsets = [0, 10], sizes = [32, 92], strides = [1, 1]} : vector<32x110xf32> to vector<32x92xf32>
    %52 = arith.maximumf %50, %51 : vector<32x92xf32>
    %53 = vector.extract_strided_slice %41 {offsets = [0, 16], sizes = [32, 92], strides = [1, 1]} : vector<32x110xf32> to vector<32x92xf32>
    %54 = arith.maximumf %52, %53 : vector<32x92xf32>
    %55 = vector.extract_strided_slice %41 {offsets = [0, 17], sizes = [32, 92], strides = [1, 1]} : vector<32x110xf32> to vector<32x92xf32>
    %56 = arith.maximumf %54, %55 : vector<32x92xf32>
    %57 = vector.extract_strided_slice %41 {offsets = [0, 18], sizes = [32, 92], strides = [1, 1]} : vector<32x110xf32> to vector<32x92xf32>
    %58 = arith.maximumf %56, %57 : vector<32x92xf32>
    %c0_12 = arith.constant 0 : index
    %c0_13 = arith.constant 0 : index
    %59 = vector.load %arg6[%c0_12, %c0_13] : memref<8x92xf32, #tpu.memory_space<vmem>>, vector<8x92xf32>
    %cst_14 = arith.constant dense<0.000000e+00> : vector<8x32xf32>
    %60 = tpu.matmul %59, %58, %cst_14 {dimension_numbers = #tpu.dot_dimension_numbers<[1], [1], [0], [0], [0, 0, 1, 0], [], []>} : vector<8x92xf32>, vector<32x92xf32>, vector<8x32xf32> -> vector<8x32xf32>
    %61 = vector.extract_strided_slice %60 {offsets = [0, 0], sizes = [2, 32], strides = [1, 1]} : vector<8x32xf32> to vector<2x32xf32>
    %62 = vector.extract_strided_slice %60 {offsets = [2, 0], sizes = [2, 32], strides = [1, 1]} : vector<8x32xf32> to vector<2x32xf32>
    %63 = vector.extract_strided_slice %60 {offsets = [4, 0], sizes = [2, 32], strides = [1, 1]} : vector<8x32xf32> to vector<2x32xf32>
    %64 = vector.extract_strided_slice %60 {offsets = [6, 0], sizes = [2, 32], strides = [1, 1]} : vector<8x32xf32> to vector<2x32xf32>
    %65 = tpu.concatenate %61, %62, %63, %64 in 1 : vector<2x32xf32>, vector<2x32xf32>, vector<2x32xf32>, vector<2x32xf32> -> vector<2x128xf32>
    %c0_15 = arith.constant 0 : index
    %c0_16 = arith.constant 0 : index
    %66 = vector.load %arg7[%c0_15, %c0_16] : memref<128x256xf32, #tpu.memory_space<vmem>>, vector<128x256xf32>
    %cst_17 = arith.constant dense<0.000000e+00> : vector<2x256xf32>
    %67 = tpu.matmul %65, %66, %cst_17 {dimension_numbers = #tpu.dot_dimension_numbers<[1], [0], [0], [1], [0, 0, 1, 1], [], []>} : vector<2x128xf32>, vector<128x256xf32>, vector<2x256xf32> -> vector<2x256xf32>
    %c0_18 = arith.constant 0 : index
    %c0_19 = arith.constant 0 : index
    %68 = vector.load %arg8[%c0_18, %c0_19] : memref<1x256xf32, #tpu.memory_space<vmem>>, vector<1x256xf32>
    %69 = vector.broadcast %68 : vector<1x256xf32> to vector<2x256xf32>
    %70 = arith.addf %67, %69 : vector<2x256xf32>
    %cst_20 = arith.constant 0.000000e+00 : f32
    %71 = vector.broadcast %cst_20 : f32 to vector<2x256xf32>
    %72 = arith.maximumf %70, %71 : vector<2x256xf32>
    %c0_21 = arith.constant 0 : index
    %c0_22 = arith.constant 0 : index
    %73 = vector.load %arg9[%c0_21, %c0_22] : memref<256x128xf32, #tpu.memory_space<vmem>>, vector<256x128xf32>
    %cst_23 = arith.constant dense<0.000000e+00> : vector<2x128xf32>
    %74 = tpu.matmul %72, %73, %cst_23 {dimension_numbers = #tpu.dot_dimension_numbers<[1], [0], [0], [1], [0, 0, 1, 1], [], []>} : vector<2x256xf32>, vector<256x128xf32>, vector<2x128xf32> -> vector<2x128xf32>
    %c0_24 = arith.constant 0 : index
    %c0_25 = arith.constant 0 : index
    %75 = vector.load %arg10[%c0_24, %c0_25] : memref<1x128xf32, #tpu.memory_space<vmem>>, vector<1x128xf32>
    %76 = vector.broadcast %75 : vector<1x128xf32> to vector<2x128xf32>
    %77 = arith.addf %74, %76 : vector<2x128xf32>
    %cst_26 = arith.constant dense<0xFF800000> : vector<2xf32>
    %78 = vector.multi_reduction <maximumf>, %77, %cst_26 [1] : vector<2x128xf32> to vector<2xf32>
    %79 = vector.shape_cast %78 : vector<2xf32> to vector<2x1xf32>
    %80 = vector.broadcast %79 : vector<2x1xf32> to vector<2x128xf32>
    %81 = arith.subf %77, %80 : vector<2x128xf32>
    %82 = math.exp %81 : vector<2x128xf32>
    %cst_27 = arith.constant dense<0.000000e+00> : vector<2xf32>
    %83 = vector.multi_reduction <add>, %82, %cst_27 [1] : vector<2x128xf32> to vector<2xf32>
    %84 = vector.shape_cast %83 : vector<2xf32> to vector<2x1xf32>
    %85 = math.log %84 : vector<2x1xf32>
    %86 = arith.addf %85, %79 : vector<2x1xf32>
    %87 = vector.broadcast %86 : vector<2x1xf32> to vector<2x128xf32>
    %88 = arith.subf %77, %87 : vector<2x128xf32>
    %c0_28 = arith.constant 0 : index
    %c0_29 = arith.constant 0 : index
    %89 = vector.load %arg11[%c0_28, %c0_29] : memref<2x128xf32, #tpu.memory_space<vmem>>, vector<2x128xf32>
    tpu.vector_store %arg11[%c0_28, %c0_29], %88 {strides = array<i32>} : memref<2x128xf32, #tpu.memory_space<vmem>>, vector<2x128xf32>,
    return
  }
  func.func @transform_0(%arg0: i32) -> (i32, i32) {
    %c0_i32 = arith.constant 0 : i32
    %c0_i32_0 = arith.constant 0 : i32
    %c0_i32_1 = arith.constant 0 : i32
    return %c0_i32, %c0_i32_0 : i32, i32
  }
  func.func @transform_1(%arg0: i32) -> (i32, i32) {
    %c0_i32 = arith.constant 0 : i32
    %c0_i32_0 = arith.constant 0 : i32
    %c0_i32_1 = arith.constant 0 : i32
    return %c0_i32, %c0_i32_0 : i32, i32
  }
  func.func @transform_2(%arg0: i32) -> (i32, i32) {
    %c0_i32 = arith.constant 0 : i32
    %c0_i32_0 = arith.constant 0 : i32
    %c0_i32_1 = arith.constant 0 : i32
    return %c0_i32, %c0_i32_0 : i32, i32
  }
  func.func @transform_3(%arg0: i32) -> (i32, i32) {
    %c0_i32 = arith.constant 0 : i32
    %c0_i32_0 = arith.constant 0 : i32
    %c0_i32_1 = arith.constant 0 : i32
    return %c0_i32, %c0_i32_0 : i32, i32
  }
  func.func @transform_4(%arg0: i32) -> (i32, i32) {
    %c0_i32 = arith.constant 0 : i32
    %c0_i32_0 = arith.constant 0 : i32
    %c0_i32_1 = arith.constant 0 : i32
    return %c0_i32, %c0_i32_0 : i32, i32
  }
  func.func @transform_5(%arg0: i32) -> (i32, i32) {
    %c0_i32 = arith.constant 0 : i32
    %c0_i32_0 = arith.constant 0 : i32
    %c0_i32_1 = arith.constant 0 : i32
    return %c0_i32, %c0_i32_0 : i32, i32
  }
  func.func @transform_6(%arg0: i32) -> (i32, i32) {
    %c0_i32 = arith.constant 0 : i32
    %c0_i32_0 = arith.constant 0 : i32
    %c0_i32_1 = arith.constant 0 : i32
    return %c0_i32, %c0_i32_0 : i32, i32
  }
  func.func @transform_7(%arg0: i32) -> (i32, i32) {
    %c0_i32 = arith.constant 0 : i32
    %c0_i32_0 = arith.constant 0 : i32
    %c0_i32_1 = arith.constant 0 : i32
    return %c0_i32, %c0_i32_0 : i32, i32
  }
  func.func @transform_8(%arg0: i32) -> (i32, i32) {
    %c0_i32 = arith.constant 0 : i32
    %c0_i32_0 = arith.constant 0 : i32
    %c0_i32_1 = arith.constant 0 : i32
    return %c0_i32, %c0_i32_0 : i32, i32
  }
  func.func @transform_9(%arg0: i32) -> (i32, i32) {
    %c0_i32 = arith.constant 0 : i32
    %c0_i32_0 = arith.constant 0 : i32
    %c0_i32_1 = arith.constant 0 : i32
    return %c0_i32, %c0_i32_0 : i32, i32
  }
  func.func @transform_10(%arg0: i32) -> (i32, i32) {
    %c0_i32 = arith.constant 0 : i32
    %c0_i32_0 = arith.constant 0 : i32
    %c0_i32_1 = arith.constant 0 : i32
    return %c0_i32, %c0_i32_0 : i32, i32
  }
}

</mosaic_0001>

<bundles_post_ra>
// kernel: simple_torch_model_forward.1
= control target key start
LH: loop header
LB: loop body
LE: loop exit
PB: predicated region body
PF: predicated region fallthrough
CT: control target
= control target key end

     0   :  { %vm95_vm0 = vcmask 1040384   ;;  %vm1970_vm1 = vmmov 1   ;;  %v1971_v7 = vmov 0.0   ;;  %vm82_vm3 = vcmask 72704   ;;  %s2570_s0 = inlined_call_operand.vmem [shape: f32[9,1152], index: 0, kind: input, shape index: {}]   ;;  %s2571_s1 = inlined_call_operand.vmem [shape: f32[32,9], index: 1, kind: input, shape index: {}]   ;;  %s2572_s2 = inlined_call_operand.vmem [shape: f32[32,1], index: 2, kind: input, shape index: {}]   ;;  %s2573_s3 = inlined_call_operand.vmem [shape: f32[32,288], index: 3, kind: input, shape index: {}]   ;;  %s2574_s4 = inlined_call_operand.vmem [shape: f32[32,1], index: 4, kind: input, shape index: {}]   ;;  %s2575_s5 = inlined_call_operand.vmem [shape: f32[8,92], index: 5, kind: input, shape index: {}]   ;;  %s2576_s6 = inlined_call_operand.vmem [shape: f32[128,256], index: 6, kind: input, shape index: {}]   ;;  %s2577_s7 = inlined_call_operand.vmem [shape: f32[1,256], index: 7, kind: input, shape index: {}]   ;;  %s2578_s8 = inlined_call_operand.vmem [shape: f32[256,128], index: 8, kind: input, shape index: {}]   ;;  %s2579_s9 = inlined_call_operand.vmem [shape: f32[1,128], index: 9, kind: input, shape index: {}]   ;;  %s2580_s10 = inlined_call_operand.hbm [shape: f32[2,128], index: 10, kind: output, shape index: {}]  }
   0x1   :  { %v41_v0 = vld [vmem:[%s2570_s0 + $0x8] sm:$0xff]  ;;  %v50_v1 = vld [vmem:[%s2570_s0 + $0x50] sm:$0x1]  ;;  %v40_v2 = vld [vmem:[%s2570_s0] sm:$0xff]  ;;  %187 = vmatprep.mubr.f32.mxu0 %v1971_v7  ;;  %205 = vmatprep.mubr.f32.mxu1 %v1971_v7  ;;  %v1972_v23 = vmov 0  }
   0x2   :  { %v1619_v3 = vpack.c.bf16 %v50_v1, %v41_v0  ;;  %vm2051_vm2 = vmpackc.low %vm95_vm0, %vm1970_vm1  ;;  %v49_v5 = vld [vmem:[%s2570_s0 + $0x48] sm:$0x1]  ;;  %v2063_v8 = vld [vmem:[%s2571_s1] sm:$0xff]  ;;  %1781 = vset.pattern.permute.xlu1 %v1972_v23  ;;  %1780 = vset.pattern.permute.xlu0 %v1972_v23 }
   0x3   :  { %v1622_v6 = vpack.c.bf16 %v49_v5, %v40_v2  ;;  %v43_v9 = vld [vmem:[%s2570_s0 + $0x18] sm:$0xff]  ;;  %v52_v10 = vld [vmem:[%s2570_s0 + $0x60] sm:$0x1]  ;;  %v42_v12 = vld [vmem:[%s2570_s0 + $0x10] sm:$0xff] }
   0x4   :  { %1621 = vmatprep.subr.msk.bf16.mxu0 %vm2051_vm2, %v1619_v3  ;;  %1761 = vmatprep.subr.msk.bf16.mxu1 %vm2051_vm2, %v1619_v3  ;;  %v1625_v11 = vpack.c.bf16 %v52_v10, %v43_v9  ;;  %v51_v13 = vld [vmem:[%s2570_s0 + $0x58] sm:$0x1]  ;;  %v45_v14 = vld [vmem:[%s2570_s0 + $0x28] sm:$0xff]  ;;  %v54_v17 = vld [vmem:[%s2570_s0 + $0x70] sm:$0x1] }
   0x5   :  { %1624 = vmatpush1.bf16.msk.msra.mxu0 %vm2051_vm2, %v1622_v6  ;;  %1762 = vmatpush1.bf16.msk.msra.mxu1 %vm2051_vm2, %v1622_v6  ;;  %v2091_v15 = vld [vmem:[%s2571_s1 + $0x18] sm:$0xff]  ;;  %v1628_v16 = vpack.c.bf16 %v51_v13, %v42_v12  ;;  %v44_v18 = vld [vmem:[%s2570_s0 + $0x20] sm:$0xff]  ;;  %v1631_v19 = vpack.c.bf16 %v54_v17, %v45_v14  ;;  %v53_v20 = vld [vmem:[%s2570_s0 + $0x68] sm:$0x1] }
   0x6   :  { %1627 = vmatprep.subr.msk.bf16.mxu1 %vm2051_vm2, %v1625_v11  ;;  %v47_v21 = vld [vmem:[%s2570_s0 + $0x38] sm:$0xff]  ;;  %v56_v22 = vld [vmem:[%s2570_s0 + $0x80] sm:$0x1]  ;;  %v1634_v24 = vpack.c.bf16 %v53_v20, %v44_v18  ;;  %v46_v26 = vld [vmem:[%s2570_s0 + $0x30] sm:$0xff] }
   0x7   :  { %v1637_v25 = vpack.c.bf16 %v56_v22, %v47_v21  ;;  %v55_v27 = vld [vmem:[%s2570_s0 + $0x78] sm:$0x1]  ;;  %v48_v28 = vld [vmem:[%s2570_s0 + $0x40] sm:$0xff]  ;;  %v57_v29 = vld [vmem:[%s2570_s0 + $0x88] sm:$0x1]  ;;  %1633 = vmatprep.subr.msk.bf16.mxu0 %vm2051_vm2, %v1631_v19 }
   0x8   :  { %1449 = vmatmul.mubr.msk.f32.vlgmr.msra.gmra.mrb[0].mxu0 %vm82_vm3, %v2063_v8  ;;  %1452 = vmatmul.mubr.msk.f32.vlgmr.msra.gmra.mrb[0].mxu1 %vm82_vm3, %v2091_v15  ;;  %v37_v30 = vld [vmem:[%s2571_s1 + $0x8] sm:$0xff]  ;;  %v1640_v31 = vpack.c.bf16 %v55_v27, %v46_v26  ;;  %v1643_v32 = vpack.c.bf16 %v57_v29, %v48_v28 }
   0x9   :  { %1630 = vmatpush1.bf16.msk.msra.mxu1 %vm2051_vm2, %v1628_v16  ;;  %193 = vmatprep.mubr.f32.mxu0 %v1971_v7 }
   0xa   :  { %276 = vmatprep.mubr.f32.mxu1 %v1971_v7 }
   0xb   :  { %15 = vsyncpa [#allocation3], 0  ;;  %1636 = vmatpush1.bf16.msk.msra.mxu0 %vm2051_vm2, %v1634_v24  ;;  %1639 = vmatprep.subr.msk.bf16.mxu1 %vm2051_vm2, %v1637_v25  ;;  %v60_v33 = vld [vmem:[%s2572_s2 + $0x10] sm:$0xff]  ;;  %v58_v34 = vld [vmem:[%s2572_s2] sm:$0xff]  ;;  %s1975_s24 = smov 127   ;;  %s1976_s25 = smov 112  }
   0xc   :  { %1450 = vmatmul.mubr.msk.f32.gmra.mrb[2].mxu0 %vm82_vm3, %v37_v30  ;;  %1455 = vmatmul.mubr.msk.f32.vlgmr.msra.gmra.mrb[2].mxu1 %vm82_vm3, %v2063_v8  ;;  %v38_v35 = vld [vmem:[%s2571_s1 + $0x10] sm:$0xff]  ;;  %v61_v36 = vld [vmem:[%s2572_s2 + $0x18] sm:$0xff]  ;;  %v59_v37 = vld [vmem:[%s2572_s2 + $0x8] sm:$0xff]  ;;  %s1973_s1 = smov 119   ;;  %s1974_s2 = smov 118   ;;  %vm768_vm4 = vcmask 261120  }
   0xd   :  { %1642 = vmatpush1.bf16.msk.msra.mxu1 %vm2051_vm2, %v1640_v31  ;;  %199 = vmatprep.mubr.f32.mxu0 %v1971_v7  ;;  %s1977_s26 = smov 126   ;;  %s1978_s27 = smov 111   ;;  %vm1982_vm5 = vmmov 0   ;;  %vm1088_vm6 = vcmask 752640   ;;  %vm1188_vm8 = vcmask 523264   ;;  %vm1190_vm9 = vcmask 785408  }
   0xe   :  { %282 = vmatprep.mubr.f32.mxu1 %v1971_v7  ;;  %1645 = vmatprep.subr.msk.bf16.mxu0 %vm2051_vm2, %v1643_v32  ;;  %s1979_s30 = smov 120   ;;  %s1980_s13 = smov 110   ;;  %vm2346_vm7 = vmpackc.low %vm1088_vm6, %vm1088_vm6  ;;  %vm1418_vm10 = vcmask 1041408  }
   0xf   :  { %74 = vperm.xlu1 %1781, %v60_v33   ;;  %64 = vperm.xlu0 %1780, %v58_v34   ;;  %s1983_s0 = smov 32   ;;  %s1984_s15 = smov 64  }
  0x10   :  { %1451 = vmatmul.mubr.msk.f32.gmra.mrb[4].mxu0 %vm82_vm3, %v38_v35  ;;  %1456 = vmatmul.mubr.msk.f32.gmra.mrb[4].mxu1 %vm82_vm3, %v37_v30  ;;  %s1985_s22 = smov 96  }
  0x11   :  { %288 = vmatprep.mubr.f32.mxu1 %v1971_v7  ;;  %365 = vmatprep.mubr.f32.mxu0 %v1971_v7 }
  0x13   :  { %79 = vperm.xlu1 %1781, %v61_v36   ;;  %69 = vperm.xlu0 %1780, %v59_v37  }
  0x14   :  { %1457 = vmatmul.mubr.msk.f32.gmra.mrb[6].mxu1 %vm82_vm3, %v38_v35  ;;  %1461 = vmatmul.mubr.msk.f32.vlgmr.msra.gmra.mrb[6].mxu0 %vm82_vm3, %v2063_v8 }
  0x15   :  { %294 = vmatprep.mubr.f32.mxu1 %v1971_v7  ;;  %371 = vmatprep.mubr.f32.mxu0 %v1971_v7 }
  0x16   :  { %1648 = vmatpush3.bf16.msk.msra.mxu0 %vm2051_vm2, %v1643_v32 }
  0x18   :  { %1458 = vmatmul.mubr.msk.f32.gmra.mrb[8].mxu1 %vm82_vm3, %v2091_v15  ;;  %1462 = vmatmul.mubr.msk.f32.gmra.mrb[8].mxu0 %vm82_vm3, %v37_v30 }
  0x19   :  { %377 = vmatprep.mubr.f32.mxu0 %v1971_v7  ;;  %454 = vmatprep.mubr.f32.mxu1 %v1971_v7 }
  0x1c   :  { %1463 = vmatmul.mubr.msk.f32.gmra.mrb[10].mxu0 %vm82_vm3, %v38_v35  ;;  %1467 = vmatmul.mubr.msk.f32.vlgmr.msra.gmra.mrb[10].mxu1 %vm82_vm3, %v2063_v8 }
  0x1d   :  { %383 = vmatprep.mubr.f32.mxu0 %v1971_v7  ;;  %460 = vmatprep.mubr.f32.mxu1 %v1971_v7 }
  0x20   :  { %1464 = vmatmul.mubr.msk.f32.gmra.mrb[12].mxu0 %vm82_vm3, %v2091_v15  ;;  %1468 = vmatmul.mubr.msk.f32.gmra.mrb[12].mxu1 %vm82_vm3, %v37_v30 }
  0x21   :  { %466 = vmatprep.mubr.f32.mxu1 %v1971_v7  ;;  %1588 = vmatprep.mubr.msk.f32.mxu0 %vm82_vm3, %v2063_v8 }
  0x24   :  { %1469 = vmatmul.mubr.msk.f32.gmra.mrb[14].mxu1 %vm82_vm3, %v38_v35  ;;  %1589 = vmatmul.mubr.msk.f32.vlgmr.msra.gmra.mrb[14].mxu0 %vm82_vm3, %v37_v30 }
  0x25   :  { %472 = vmatprep.mubr.f32.mxu1 %v1971_v7  ;;  %1591 = vmatprep.mubr.msk.f32.mxu0 %vm82_vm3, %v38_v35 }
  0x28   :  { %1470 = vmatmul.mubr.msk.f32.gmra.mrb[16].mxu1 %vm82_vm3, %v2091_v15  ;;  %1592 = vmatmul.mubr.msk.f32.gmra.mrb[16].mxu0 %vm82_vm3, %v2091_v15 }
  0x8e   :  { %v2198_v38 = vpop.permute.xlu1 %74  ;;  %v2200_v39 = vpop.permute.xlu0 %64 }
  0x92   :  { %v2202_v40 = vpop.permute.xlu1 %79  ;;  %v2208_v49 = vpop.permute.xlu0 %69 }
  0xdb   :  { %v207_v41 = vpop.f32.mrb[0].mxu1  ;;  %v189_v42 = vpop.f32.mrb[0].mxu0 }
  0xdc   :  { %v208_v43 = vadd.f32 %v207_v41, %v2202_v40  ;;  %v209_v44 = vpop.f32.mrb[1].mxu1  ;;  %v190_v45 = vadd.f32 %v189_v42, %v2200_v39  ;;  %v191_v46 = vpop.f32.mrb[1].mxu0 }
  0xdd   :  { %v210_v47 = vadd.f32 %v209_v44, %v2202_v40  ;;  %v192_v48 = vadd.f32 %v191_v46, %v2200_v39 }
  0xde   :  { %v591_v50 = vmax.f32 %v208_v43, 0.0  ;;  %v564_v51 = vmax.f32 %v190_v45, 0.0 }
  0xdf   :  { %v592_v52 = vmax.f32 %v210_v47, 0.0  ;;  %v565_v53 = vmax.f32 %v192_v48, 0.0  ;;  %v278_v54 = vpop.f32.mrb[2].mxu1  ;;  %v195_v55 = vpop.f32.mrb[2].mxu0 }
  0xe0   :  { %v279_v56 = vadd.f32 %v278_v54, %v2200_v39  ;;  %v280_v57 = vpop.f32.mrb[3].mxu1  ;;  %v196_v58 = vadd.f32 %v195_v55, %v2208_v49  ;;  %v197_v59 = vpop.f32.mrb[3].mxu0 }
  0xe1   :  { %v603_v60 = vmax.f32 %v591_v50, %v592_v52  ;;  %v600_v61 = vmax.f32 %v564_v51, %v565_v53  ;;  %v281_v62 = vadd.f32 %v280_v57, %v2200_v39  ;;  %v198_v63 = vadd.f32 %v197_v59, %v2208_v49 }
  0xe2   :  { %v566_v0 = vmax.f32 %v279_v56, 0.0  ;;  %v573_v1 = vmax.f32 %v196_v58, 0.0 }
  0xe3   :  { %v567_v2 = vmax.f32 %v281_v62, 0.0  ;;  %v574_v3 = vmax.f32 %v198_v63, 0.0  ;;  %v284_v4 = vpop.f32.mrb[4].mxu1  ;;  %v201_v5 = vpop.f32.mrb[4].mxu0 }
  0xe4   :  { %v604_v6 = vmax.f32 %v600_v61, %v566_v0  ;;  %v285_v8 = vadd.f32 %v284_v4, %v2208_v49  ;;  %v202_v9 = vadd.f32 %v201_v5, %v2198_v38  ;;  %v286_v10 = vpop.f32.mrb[5].mxu1  ;;  %v203_v11 = vpop.f32.mrb[5].mxu0 }
  0xe5   :  { %v601_v12 = vmax.f32 %v573_v1, %v574_v3  ;;  %v287_v13 = vadd.f32 %v286_v10, %v2208_v49  ;;  %v204_v14 = vadd.f32 %v203_v11, %v2198_v38 }
  0xe6   :  { %v608_v15 = vmax.f32 %v604_v6, %v567_v2  ;;  %v575_v16 = vmax.f32 %v285_v8, 0.0  ;;  %v582_v17 = vmax.f32 %v202_v9, 0.0 }
  0xe7   :  { %v576_v18 = vmax.f32 %v287_v13, 0.0  ;;  %v583_v19 = vmax.f32 %v204_v14, 0.0  ;;  %v290_v20 = vpop.f32.mrb[6].mxu1  ;;  %v367_v21 = vpop.f32.mrb[6].mxu0 }
  0xe8   :  { %v605_v22 = vmax.f32 %v601_v12, %v575_v16  ;;  %v291_v23 = vadd.f32 %v290_v20, %v2198_v38  ;;  %v368_v24 = vadd.f32 %v367_v21, %v2200_v39  ;;  %v292_v25 = vpop.f32.mrb[7].mxu1  ;;  %v369_v26 = vpop.f32.mrb[7].mxu0 }
  0xe9   :  { %v602_v27 = vmax.f32 %v582_v17, %v583_v19  ;;  %v293_v28 = vadd.f32 %v292_v25, %v2198_v38  ;;  %v370_v29 = vadd.f32 %v369_v26, %v2200_v39 }
  0xea   :  { %v609_v30 = vmax.f32 %v605_v22, %v576_v18  ;;  %v584_v31 = vmax.f32 %v291_v23, 0.0  ;;  %v568_v32 = vmax.f32 %v368_v24, 0.0 }
  0xeb   :  { %v585_v33 = vmax.f32 %v293_v28, 0.0  ;;  %v569_v34 = vmax.f32 %v370_v29, 0.0  ;;  %v296_v35 = vpop.f32.mrb[8].mxu1  ;;  %v373_v36 = vpop.f32.mrb[8].mxu0 }
  0xec   :  { %v606_v37 = vmax.f32 %v602_v27, %v584_v31  ;;  %v612_v41 = vmax.f32 %v608_v15, %v568_v32  ;;  %v297_v42 = vadd.f32 %v296_v35, %v2202_v40  ;;  %v374_v43 = vadd.f32 %v373_v36, %v2208_v49  ;;  %v298_v44 = vpop.f32.mrb[9].mxu1  ;;  %v375_v45 = vpop.f32.mrb[9].mxu0 }
  0xed   :  { %v299_v46 = vadd.f32 %v298_v44, %v2202_v40  ;;  %v376_v47 = vadd.f32 %v375_v45, %v2208_v49 }
  0xee   :  { %v610_v48 = vmax.f32 %v606_v37, %v585_v33  ;;  %v616_v50 = vmax.f32 %v612_v41, %v569_v34  ;;  %v593_v51 = vmax.f32 %v297_v42, 0.0  ;;  %v577_v52 = vmax.f32 %v374_v43, 0.0 }
  0xef   :  { %v594_v53 = vmax.f32 %v299_v46, 0.0  ;;  %v578_v54 = vmax.f32 %v376_v47, 0.0  ;;  %v379_v55 = vpop.f32.mrb[10].mxu0  ;;  %v456_v56 = vpop.f32.mrb[10].mxu1 }
  0xf0   :  { %v607_v57 = vmax.f32 %v603_v60, %v593_v51  ;;  %v613_v58 = vmax.f32 %v609_v30, %v577_v52  ;;  %v380_v59 = vadd.f32 %v379_v55, %v2198_v38  ;;  %v457_v61 = vadd.f32 %v456_v56, %v2200_v39  ;;  %v381_v62 = vpop.f32.mrb[11].mxu0  ;;  %v458_v63 = vpop.f32.mrb[11].mxu1 }
  0xf1   :  { %v382_v0 = vadd.f32 %v381_v62, %v2198_v38  ;;  %v459_v1 = vadd.f32 %v458_v63, %v2200_v39 }
  0xf2   :  { %v611_v2 = vmax.f32 %v607_v57, %v594_v53  ;;  %v617_v3 = vmax.f32 %v613_v58, %v578_v54  ;;  %v586_v4 = vmax.f32 %v380_v59, 0.0  ;;  %v570_v5 = vmax.f32 %v457_v61, 0.0 }
  0xf3   :  { %v587_v6 = vmax.f32 %v382_v0, 0.0  ;;  %v571_v8 = vmax.f32 %v459_v1, 0.0  ;;  %v385_v9 = vpop.f32.mrb[12].mxu0  ;;  %v462_v10 = vpop.f32.mrb[12].mxu1  ;;  %v733_v1 = vld [vmem:[%s2573_s3 + $0x8] sm:$0xff] }
  0xf4   :  { %v614_v60 = vmax.f32 %v610_v48, %v586_v4  ;;  %v620_v11 = vmax.f32 %v616_v50, %v570_v5  ;;  %v386_v12 = vadd.f32 %v385_v9, %v2202_v40  ;;  %v463_v13 = vadd.f32 %v462_v10, %v2208_v49  ;;  %v387_v14 = vpop.f32.mrb[13].mxu0  ;;  %v464_v15 = vpop.f32.mrb[13].mxu1  ;;  %845 = vmatprep.mubr.f32.mxu1 %v733_v1  ;;  %v746_v4 = vld [vmem:[%s2574_s4 + $0x10] sm:$0xff]  ;;  %v745_v5 = vld [vmem:[%s2574_s4 + $0x8] sm:$0xff] }
  0xf5   :  { %v388_v16 = vadd.f32 %v387_v14, %v2202_v40  ;;  %v465_v17 = vadd.f32 %v464_v15, %v2208_v49 }
  0xf6   :  { %v618_v18 = vmax.f32 %v614_v60, %v587_v6  ;;  %v624_v19 = vmax.f32 %v620_v11, %v571_v8  ;;  %v595_v20 = vmax.f32 %v386_v12, 0.0  ;;  %v579_v21 = vmax.f32 %v463_v13, 0.0  ;;  %v747_v6 = vld [vmem:[%s2574_s4 + $0x18] sm:$0xff] }
  0xf7   :  { %v596_v22 = vmax.f32 %v388_v16, 0.0  ;;  %v580_v23 = vmax.f32 %v465_v17, 0.0  ;;  %v468_v24 = vpop.f32.mrb[14].mxu1  ;;  %v1590_v25 = vpop.f32.mrb[14].mxu0 }
  0xf8   :  { %v615_v26 = vmax.f32 %v611_v2, %v595_v20  ;;  %v621_v27 = vmax.f32 %v617_v3, %v579_v21  ;;  %v469_v28 = vadd.f32 %v468_v24, %v2198_v38  ;;  %v551_v29 = vadd.f32 %v1590_v25, %v2208_v49  ;;  %v470_v30 = vpop.f32.mrb[15].mxu1  ;;  %v545_v31 = vpop.f32.mrb[15].mxu0  ;;  %v734_v2 = vld [vmem:[%s2573_s3 + $0x10] sm:$0xff]  ;;  %v744_v3 = vld [vmem:[%s2574_s4] sm:$0xff] }
  0xf9   :  { %v471_v32 = vadd.f32 %v470_v30, %v2198_v38  ;;  %v546_v33 = vadd.f32 %v545_v31, %v2200_v39  ;;  %1602 = vmatprep.mubr.msk.f32.mxu0 %vm768_vm4, %v734_v2 }
  0xfa   :  { %v619_v34 = vmax.f32 %v615_v26, %v596_v22  ;;  %v625_v35 = vmax.f32 %v621_v27, %v580_v23  ;;  %v588_v36 = vmax.f32 %v469_v28, 0.0  ;;  %v581_v37 = vmax.f32 %v551_v29, 0.0 }
  0xfb   :  { %v589_v41 = vmax.f32 %v471_v32, 0.0  ;;  %v572_v42 = vmax.f32 %v546_v33, 0.0  ;;  %v474_v43 = vpop.f32.mrb[16].mxu1  ;;  %v1593_v44 = vpop.f32.mrb[16].mxu0 }
  0xfc   :  { %v622_v45 = vmax.f32 %v618_v18, %v588_v36  ;;  %v2238_v46 = vmax.f32 %v625_v35, %v581_v37  ;;  %v475_v47 = vadd.f32 %v474_v43, %v2202_v40  ;;  %v476_v49 = vpop.f32.mrb[17].mxu1  ;;  %v555_v48 = vpop.f32.mrb[17].mxu0  ;;  %v561_v54 = vadd.f32 %v1593_v44, %v2202_v40 }
  0xfd   :  { %v628_v50 = vmax.f32 %v624_v19, %v572_v42  ;;  %v477_v51 = vadd.f32 %v476_v49, %v2202_v40  ;;  %v556_v39 = vadd.f32 %v555_v48, %v2198_v38 }
  0xfe   :  { %v626_v52 = vmax.f32 %v622_v45, %v589_v41  ;;  %v597_v53 = vmax.f32 %v475_v47, 0.0  ;;  %v599_v61 = vmax.f32 %v561_v54, 0.0 }
  0xff   :  { %v598_v55 = vmax.f32 %v477_v51, 0.0  ;;  %v590_v56 = vmax.f32 %v556_v39, 0.0  ;;  %v1782_v57 = vpack.i.bf16 %v2238_v46, %v628_v50  ;;  %v1651_v63 = vpack.c.bf16 %v2238_v46, %v628_v50 }
 0x100   :  { %v623_v58 = vmax.f32 %v619_v34, %v597_v53 }
 0x101   :  { %v2245_v59 = vmax.f32 %v626_v52, %v590_v56  ;;  %1783 = vrot.lane.b32.xlu0 %v1782_v57, %s1973_s1 }
 0x102   :  { %v627_v62 = vmax.f32 %v623_v58, %v598_v55 }
 0x104   :  { %v631_v0 = vmax.f32 %v627_v62, %v599_v61 }
 0x105   :  { %1793 = vrot.lane.b32.xlu0 %v1782_v57, %s1974_s2 }
 0x106   :  { %v1787_v38 = vpack.i.bf16 %v631_v0, %v2245_v59  ;;  %v1655_v40 = vpack.c.bf16 %v631_v0, %v2245_v59 }
 0x108   :  { %1788 = vrot.lane.b32.xlu1 %v1787_v38, %s1973_s1 }
 0x109   :  { %1803 = vrot.lane.b32.xlu0 %v1787_v38, %s1974_s2 }
 0x10c   :  { %1798 = vrot.lane.b32.xlu1 %v1782_v57, %s1975_s24 }
 0x10d   :  { %1808 = vrot.lane.b32.xlu0 %v1782_v57, %s1976_s25 }
 0x110   :  { %1813 = vrot.lane.b32.xlu1 %v1787_v38, %s1975_s24 }
 0x111   :  { %1823 = vrot.lane.b32.xlu0 %v1787_v38, %s1976_s25 }
 0x114   :  { %1818 = vrot.lane.b32.xlu1 %v1782_v57, %s1977_s26 }
 0x115   :  { %1828 = vrot.lane.b32.xlu0 %v1782_v57, %s1978_s27 }
 0x118   :  { %1833 = vrot.lane.b32.xlu1 %v1787_v38, %s1977_s26 }
 0x119   :  { %1843 = vrot.lane.b32.xlu0 %v1787_v38, %s1978_s27 }
 0x11c   :  { %1838 = vrot.lane.b32.xlu1 %v1782_v57, %s1979_s30 }
 0x11d   :  { %1853 = vrot.lane.b32.xlu0 %v1782_v57, %s1980_s13 }
 0x120   :  { %1848 = vrot.lane.b32.xlu1 %v1787_v38, %s1979_s30 }
 0x121   :  { %750 = vperm.xlu0 %1780, %v744_v3  }
 0x124   :  { %1858 = vrot.lane.b32.xlu1 %v1787_v38, %s1980_s13 }
 0x125   :  { %760 = vperm.xlu0 %1780, %v746_v4  }
 0x128   :  { %755 = vperm.xlu1 %1781, %v745_v5  }
 0x12c   :  { %765 = vperm.xlu1 %1781, %v747_v6  }
 0x173   :  { %v1784_v8 = vpop.permute.xlu0 %1783 }
 0x174   :  { %v1786_v9 = vunpack.i.h.bf16 %v1784_v8  ;;  %v1785_v10 = vunpack.i.l.bf16 %v1784_v8  ;;  %v732_v8 = vld [vmem:[%s2573_s3] sm:$0xff] }
 0x176   :  { %v1649_v60 = vpack.c.bf16 %v1786_v9, %v1785_v10  ;;  %v736_v10 = vld [vmem:[%s2573_s3 + $0x20] sm:$0xff] }
 0x177   :  { %v1794_v11 = vpop.permute.xlu0 %1793 }
 0x178   :  { %1650 = vmatprep.subr.bf16.mxu1 %v1649_v60  ;;  %v1796_v12 = vunpack.i.h.bf16 %v1794_v11  ;;  %v1795_v13 = vunpack.i.l.bf16 %v1794_v11  ;;  %v735_v60 = vld [vmem:[%s2573_s3 + $0x18] sm:$0xff]  ;;  %v737_v11 = vld [vmem:[%s2573_s3 + $0x28] sm:$0xff] }
 0x179   :  { %1652 = vmatpush3.bf16.msra.mxu1 %v1651_v63 }
 0x17a   :  { %v1789_v14 = vpop.permute.xlu1 %1788  ;;  %v1657_v19 = vpack.c.bf16 %v1796_v12, %v1795_v13  ;;  %v739_v12 = vld [vmem:[%s2573_s3 + $0x38] sm:$0xff]  ;;  %v740_v13 = vld [vmem:[%s2573_s3 + $0x40] sm:$0xff] }
 0x17b   :  { %v1791_v15 = vunpack.i.h.bf16 %v1789_v14  ;;  %v1790_v16 = vunpack.i.l.bf16 %v1789_v14  ;;  %v1804_v17 = vpop.permute.xlu0 %1803  ;;  %v738_v14 = vld [vmem:[%s2573_s3 + $0x30] sm:$0xff] }
 0x17c   :  { %v1806_v21 = vunpack.i.h.bf16 %v1804_v17  ;;  %v1805_v22 = vunpack.i.l.bf16 %v1804_v17  ;;  %v741_v17 = vld [vmem:[%s2573_s3 + $0x48] sm:$0xff] }
 0x17d   :  { %v1653_v18 = vpack.c.bf16 %v1791_v15, %v1790_v16  ;;  %v743_v15 = vld [vmem:[%s2573_s3 + $0x58] sm:$0xff]  ;;  %v742_v16 = vld [vmem:[%s2573_s3 + $0x50] sm:$0xff] }
 0x17e   :  { %v1799_v20 = vpop.permute.xlu1 %1798  ;;  %v1661_v30 = vpack.c.bf16 %v1806_v21, %v1805_v22 }
 0x17f   :  { %v1801_v23 = vunpack.i.h.bf16 %v1799_v20  ;;  %v1800_v24 = vunpack.i.l.bf16 %v1799_v20  ;;  %v1809_v25 = vpop.permute.xlu0 %1808  ;;  %1654 = vmatprep.subr.bf16.mxu1 %v1653_v18 }
 0x180   :  { %1656 = vmatpush3.bf16.msra.mxu1 %v1655_v40  ;;  %v1811_v27 = vunpack.i.h.bf16 %v1809_v25  ;;  %v1810_v28 = vunpack.i.l.bf16 %v1809_v25 }
 0x181   :  { %v1659_v26 = vpack.c.bf16 %v1801_v23, %v1800_v24  ;;  %1658 = vmatprep.subr.bf16.mxu1 %v1657_v19 }
 0x182   :  { %v1814_v29 = vpop.permute.xlu1 %1813  ;;  %v1665_v35 = vpack.c.bf16 %v1811_v27, %v1810_v28 }
 0x183   :  { %v1816_v31 = vunpack.i.h.bf16 %v1814_v29  ;;  %v1815_v32 = vunpack.i.l.bf16 %v1814_v29  ;;  %v1824_v33 = vpop.permute.xlu0 %1823 }
 0x184   :  { %1660 = vmatpush3.bf16.msra.mxu1 %v1659_v26  ;;  %v1826_v37 = vunpack.i.h.bf16 %v1824_v33  ;;  %v1825_v41 = vunpack.i.l.bf16 %v1824_v33 }
 0x185   :  { %v1663_v34 = vpack.c.bf16 %v1816_v31, %v1815_v32  ;;  %1662 = vmatprep.subr.bf16.mxu1 %v1661_v30 }
 0x186   :  { %v1819_v36 = vpop.permute.xlu1 %1818  ;;  %v1669_v48 = vpack.c.bf16 %v1826_v37, %v1825_v41 }
 0x187   :  { %v1821_v42 = vunpack.i.h.bf16 %v1819_v36  ;;  %v1820_v43 = vunpack.i.l.bf16 %v1819_v36  ;;  %v1829_v44 = vpop.permute.xlu0 %1828 }
 0x188   :  { %1664 = vmatpush3.bf16.msra.mxu1 %v1663_v34  ;;  %v1831_v46 = vunpack.i.h.bf16 %v1829_v44  ;;  %v1830_v47 = vunpack.i.l.bf16 %v1829_v44 }
 0x189   :  { %v1667_v45 = vpack.c.bf16 %v1821_v42, %v1820_v43  ;;  %1666 = vmatprep.subr.bf16.mxu1 %v1665_v35 }
 0x18a   :  { %v1834_v49 = vpop.permute.xlu1 %1833  ;;  %v1673_v53 = vpack.c.bf16 %v1831_v46, %v1830_v47 }
 0x18b   :  { %v1836_v50 = vunpack.i.h.bf16 %v1834_v49  ;;  %v1835_v51 = vunpack.i.l.bf16 %v1834_v49  ;;  %v1844_v39 = vpop.permute.xlu0 %1843 }
 0x18c   :  { %1668 = vmatpush3.bf16.msra.mxu1 %v1667_v45  ;;  %v1846_v55 = vunpack.i.h.bf16 %v1844_v39  ;;  %v1845_v56 = vunpack.i.l.bf16 %v1844_v39 }
 0x18d   :  { %v1671_v52 = vpack.c.bf16 %v1836_v50, %v1835_v51  ;;  %1670 = vmatprep.subr.bf16.mxu1 %v1669_v48 }
 0x18e   :  { %v1839_v54 = vpop.permute.xlu1 %1838  ;;  %v1677_v40 = vpack.c.bf16 %v1846_v55, %v1845_v56 }
 0x18f   :  { %v1841_v57 = vunpack.i.h.bf16 %v1839_v54  ;;  %v1840_v58 = vunpack.i.l.bf16 %v1839_v54  ;;  %v1854_v59 = vpop.permute.xlu0 %1853  ;;  %v1981_v54 = vmov 0.0|0.0  }
 0x190   :  { %v1856_v61 = vunpack.i.h.bf16 %v1854_v59  ;;  %v1855_v62 = vunpack.i.l.bf16 %v1854_v59  ;;  %1672 = vmatpush3.bf16.msra.mxu1 %v1671_v52 }
 0x191   :  { %v1675_v63 = vpack.c.bf16 %v1841_v57, %v1840_v58  ;;  %1674 = vmatprep.subr.bf16.mxu1 %v1673_v53 }
 0x192   :  { %v1681_v0 = vpack.c.bf16 %v1856_v61, %v1855_v62  ;;  %v1849_v38 = vpop.permute.xlu1 %1848 }
 0x193   :  { %v1851_v1 = vunpack.i.h.bf16 %v1849_v38  ;;  %v1850_v2 = vunpack.i.l.bf16 %v1849_v38 }
 0x194   :  { %1676 = vmatpush3.bf16.msra.mxu1 %v1675_v63  ;;  %1682 = vmatprep.subr.bf16.mxu0 %v1681_v0 }
 0x195   :  { %v1679_v3 = vpack.c.bf16 %v1851_v1, %v1850_v2  ;;  %1678 = vmatprep.subr.bf16.mxu1 %v1677_v40  ;;  %1684 = vmatpush3.bf16.msra.mxu0 %v1681_v0 }
 0x196   :  { %v1859_v4 = vpop.permute.xlu1 %1858 }
 0x197   :  { %v1861_v5 = vunpack.i.h.bf16 %v1859_v4  ;;  %v1860_v6 = vunpack.i.l.bf16 %v1859_v4 }
 0x198   :  { %1680 = vmatpush3.bf16.msra.mxu1 %v1679_v3 }
 0x199   :  { %v1685_v9 = vpack.c.bf16 %v1861_v5, %v1860_v6 }
 0x19b   :  { %846 = vmatmul.mubr.f32.vlgmr.msra.gmra.mrb[18].mxu1 %v732_v8  ;;  %1686 = vmatprep.subr.bf16.mxu0 %v1685_v9 }
 0x19c   :  { %1688 = vmatpush3.bf16.msra.mxu0 %v1685_v9  ;;  %850 = vmatprep.mubr.f32.mxu1 %v736_v10 }
 0x19d   :  { %1689 = vmatprep.subr.bf16.mxu0 %v1981_v54 }
 0x19f   :  { %851 = vmatmul.mubr.f32.gmra.mrb[20].mxu1 %v735_v60  ;;  %1603 = vmatmul.mubr.msk.f32.vlgmr.msra.gmra.mrb[18].mxu0 %vm768_vm4, %v737_v11 }
 0x1a0   :  { %855 = vmatprep.mubr.f32.mxu1 %v739_v12  ;;  %1605 = vmatprep.mubr.msk.f32.mxu0 %vm768_vm4, %v740_v13  ;;  %v751_v21 = vpop.permute.xlu0 %750 }
 0x1a3   :  { %856 = vmatmul.mubr.f32.gmra.mrb[22].mxu1 %v738_v14  ;;  %1606 = vmatmul.mubr.msk.f32.gmra.mrb[20].mxu0 %vm768_vm4, %v743_v15 }
 0x1a4   :  { %860 = vmatprep.mubr.f32.mxu1 %v742_v16  ;;  %v761_v37 = vpop.permute.xlu0 %760  ;;  %1616 = vmatprep.mubr.msk.f32.mxu0 %vm1982_vm5, %v1971_v7 }
 0x1a7   :  { %861 = vmatmul.mubr.f32.gmra.mrb[24].mxu1 %v741_v17  ;;  %v756_v29 = vpop.permute.xlu1 %755 }
 0x1a8   :  { %1300 = vmatprep.mubr.f32.mxu1 %v1971_v7 }
 0x1ab   :  { %v766_v48 = vpop.permute.xlu1 %765 }
 0x26e   :  { %v1524_v18 = vpop.f32.mrb[18].mxu1 }
 0x26f   :  { %v1525_v19 = vpop.f32.mrb[19].mxu1 }
 0x270   :  { %v1526_v20 = vadd.f32 %v1525_v19, %v1524_v18 }
 0x272   :  { %v1527_v22 = vpop.f32.mrb[20].mxu1  ;;  %v1604_v23 = vpop.f32.mrb[18].mxu0  ;;  %v848_v24 = vadd.f32 %v1526_v20, %v751_v21 }
 0x273   :  { %v1528_v25 = vpop.f32.mrb[21].mxu1  ;;  %v932_v26 = vpop.f32.mrb[19].mxu0 }
 0x274   :  { %v1529_v27 = vadd.f32 %v1528_v25, %v1527_v22  ;;  %v933_v28 = vadd.f32 %v932_v26, %v848_v24 }
 0x276   :  { %v853_v30 = vadd.f32 %v1529_v27, %v756_v29  ;;  %v1530_v31 = vpop.f32.mrb[22].mxu1  ;;  %v1607_v32 = vpop.f32.mrb[20].mxu0  ;;  %v951_v42 = vmax.f32 %v933_v28, 0.0 }
 0x277   :  { %v1531_v33 = vpop.f32.mrb[23].mxu1  ;;  %v942_v34 = vpop.f32.mrb[21].mxu0 }
 0x278   :  { %v938_v35 = vadd.f32 %v1604_v23, %v853_v30  ;;  %v1532_v36 = vadd.f32 %v1531_v33, %v1530_v31 }
 0x27a   :  { %v952_v41 = vmax.f32 %v938_v35, 0.0  ;;  %v1533_v43 = vpop.f32.mrb[24].mxu1  ;;  %v858_v44 = vadd.f32 %v1532_v36, %v761_v37 }
 0x27b   :  { %v1534_v45 = vpop.f32.mrb[25].mxu1 }
 0x27c   :  { %v1535_v46 = vadd.f32 %v1534_v45, %v1533_v43  ;;  %v2319_v47 = vadd.f32 %v942_v34, %v858_v44  ;;  %v1867_v49 = vpack.i.bf16 %v952_v41, %v951_v42 }
 0x27e   :  { %v863_v50 = vadd.f32 %v1535_v46, %v766_v48  ;;  %1868 = vrot.lane.b32.xlu1 %v1867_v49, %s1977_s26  ;;  %1863 = vrot.lane.b32.xlu0 %v1867_v49, %s1975_s24  ;;  %v953_v52 = vmax.f32 %v2319_v47, 0.0  ;;  %v1218_v47 = vld [vmem:[%s2576_s6 + $0xd0] sm:$0xff] }
 0x280   :  { %v948_v51 = vadd.f32 %v1607_v32, %v863_v50 }
 0x282   :  { %v954_v39 = vmax.f32 %v948_v51, 0.0  ;;  %1878 = vrot.lane.b32.xlu1 %v1867_v49, %s1973_s1  ;;  %1873 = vrot.lane.b32.xlu0 %v1867_v49, %s1979_s30 }
 0x284   :  { %v1902_v53 = vpack.i.bf16 %v954_v39, %v953_v52 }
 0x286   :  { %1883 = vrot.lane.b32.xlu1 %v1867_v49, %s1974_s2  ;;  %1903 = vrot.lane.b32.xlu0 %v1902_v53, %s1975_s24 }
 0x28a   :  { %1888 = vrot.lane.b32.xlu1 %v1867_v49, %s1976_s25  ;;  %1908 = vrot.lane.b32.xlu0 %v1902_v53, %s1977_s26 }
 0x28e   :  { %1893 = vrot.lane.b32.xlu1 %v1867_v49, %s1978_s27  ;;  %1913 = vrot.lane.b32.xlu0 %v1902_v53, %s1979_s30 }
 0x292   :  { %1898 = vrot.lane.b32.xlu1 %v1867_v49, %s1980_s13  ;;  %1918 = vrot.lane.b32.xlu0 %v1902_v53, %s1973_s1 }
 0x296   :  { %1928 = vrot.lane.b32.xlu1 %v1902_v53, %s1976_s25  ;;  %1923 = vrot.lane.b32.xlu0 %v1902_v53, %s1974_s2 }
 0x29a   :  { %1938 = vrot.lane.b32.xlu1 %v1902_v53, %s1980_s13  ;;  %1933 = vrot.lane.b32.xlu0 %v1902_v53, %s1978_s27 }
 0x2f0   :  { %v1869_v55 = vpop.permute.xlu1 %1868  ;;  %v1864_v56 = vpop.permute.xlu0 %1863 }
 0x2f1   :  { %v1866_v57 = vunpack.i.h.bf16 %v1864_v56  ;;  %v1865_v58 = vunpack.i.l.bf16 %v1864_v56  ;;  %v1871_v62 = vunpack.i.h.bf16 %v1869_v55  ;;  %v1870_v63 = vunpack.i.l.bf16 %v1869_v55 }
 0x2f3   :  { %v972_v59 = vmax.f32 %v952_v41, %v1866_v57  ;;  %v971_v61 = vmax.f32 %v951_v42, %v1865_v58 }
 0x2f4   :  { %v1879_v0 = vpop.permute.xlu1 %1878  ;;  %v1874_v38 = vpop.permute.xlu0 %1873 }
 0x2f5   :  { %v1876_v40 = vunpack.i.h.bf16 %v1874_v38  ;;  %v1875_v1 = vunpack.i.l.bf16 %v1874_v38  ;;  %v987_v2 = vmax.f32 %v971_v61, %v1870_v63  ;;  %v988_v3 = vmax.f32 %v972_v59, %v1871_v62 }
 0x2f6   :  { %v1880_v8 = vunpack.i.l.bf16 %v1879_v0  ;;  %v1881_v9 = vunpack.i.h.bf16 %v1879_v0 }
 0x2f7   :  { %v1003_v4 = vmax.f32 %v987_v2, %v1875_v1  ;;  %v1004_v6 = vmax.f32 %v988_v3, %v1876_v40 }
 0x2f8   :  { %v1884_v7 = vpop.permute.xlu1 %1883  ;;  %v1904_v5 = vpop.permute.xlu0 %1903 }
 0x2f9   :  { %v1885_v10 = vunpack.i.l.bf16 %v1884_v7  ;;  %v1019_v60 = vmax.f32 %v1003_v4, %v1880_v8  ;;  %v1886_v13 = vunpack.i.h.bf16 %v1884_v7  ;;  %v1020_v14 = vmax.f32 %v1004_v6, %v1881_v9 }
 0x2fa   :  { %v1906_v15 = vunpack.i.h.bf16 %v1904_v5  ;;  %v1905_v19 = vunpack.i.l.bf16 %v1904_v5 }
 0x2fb   :  { %v1035_v18 = vmax.f32 %v1019_v60, %v1885_v10  ;;  %v1036_v23 = vmax.f32 %v1020_v14, %v1886_v13  ;;  %v1087_v10 = vld [vmem:[%s2575_s5] sm:$0xff]  ;;  %v1195_v60 = vld [vmem:[%s2576_s6 + $0x18] sm:$0xff]  ;;  %v1194_v13 = vld [vmem:[%s2576_s6 + $0x10] sm:$0xff] }
 0x2fc   :  { %v1889_v11 = vpop.permute.xlu1 %1888  ;;  %v1909_v12 = vpop.permute.xlu0 %1908  ;;  %v974_v26 = vmax.f32 %v954_v39, %v1906_v15  ;;  %v973_v31 = vmax.f32 %v953_v52, %v1905_v19  ;;  %v1197_v14 = vld [vmem:[%s2576_s6 + $0x28] sm:$0xff]  ;;  %v1199_v15 = vld [vmem:[%s2576_s6 + $0x38] sm:$0xff]  ;;  %v1198_v19 = vld [vmem:[%s2576_s6 + $0x30] sm:$0xff] }
 0x2fd   :  { %v1890_v16 = vunpack.i.l.bf16 %v1889_v11  ;;  %v1891_v17 = vunpack.i.h.bf16 %v1889_v11  ;;  %v1911_v20 = vunpack.i.h.bf16 %v1909_v12  ;;  %v1910_v28 = vunpack.i.l.bf16 %v1909_v12  ;;  %v1192_v11 = vld [vmem:[%s2576_s6] sm:$0xff] }
 0x2ff   :  { %v1051_v27 = vmax.f32 %v1035_v18, %v1890_v16  ;;  %v1052_v29 = vmax.f32 %v1036_v23, %v1891_v17  ;;  %v990_v32 = vmax.f32 %v974_v26, %v1911_v20  ;;  %v989_v44 = vmax.f32 %v973_v31, %v1910_v28  ;;  %v1196_v18 = vld [vmem:[%s2576_s6 + $0x20] sm:$0xff]  ;;  %v1201_v20 = vld [vmem:[%s2576_s6 + $0x48] sm:$0xff]  ;;  %v1206_v31 = vld [vmem:[%s2576_s6 + $0x70] sm:$0xff] }
 0x300   :  { %v1894_v21 = vpop.permute.xlu1 %1893  ;;  %v1914_v22 = vpop.permute.xlu0 %1913  ;;  %v1699_v16 = vpack.c.bf16 %v1194_v13, %v1192_v11  ;;  %v1701_v17 = vpack.c.bf16 %v1199_v15, %v1197_v14  ;;  %v1205_v26 = vld [vmem:[%s2576_s6 + $0x68] sm:$0xff]  ;;  %v1331_v14 = vld [vmem:[%s2578_s8 + $0xb0] sm:$0xff]  ;;  %v1332_v15 = vld [vmem:[%s2578_s8 + $0xb8] sm:$0xff] }
 0x301   :  { %v1896_v24 = vunpack.i.h.bf16 %v1894_v21  ;;  %v1895_v25 = vunpack.i.l.bf16 %v1894_v21  ;;  %v1916_v30 = vunpack.i.h.bf16 %v1914_v22  ;;  %v1915_v34 = vunpack.i.l.bf16 %v1914_v22  ;;  %v1203_v21 = vld [vmem:[%s2576_s6 + $0x58] sm:$0xff]  ;;  %v1314_v13 = vld [vmem:[%s2578_s8 + $0x28] sm:$0xff] }
 0x302   :  { %v1703_v22 = vpack.c.bf16 %v1198_v19, %v1196_v18  ;;  %v1705_v23 = vpack.c.bf16 %v1203_v21, %v1201_v20  ;;  %v1741_v18 = vpack.c.bf16 %v1332_v15, %v1331_v14  ;;  %v1315_v19 = vld [vmem:[%s2578_s8 + $0x30] sm:$0xff]  ;;  %v1316_v20 = vld [vmem:[%s2578_s8 + $0x38] sm:$0xff]  ;;  %v1333_v21 = vld [vmem:[%s2578_s8 + $0xc0] sm:$0xff] }
 0x303   :  { %v1067_v33 = vmax.f32 %v1051_v27, %v1895_v25  ;;  %v1068_v37 = vmax.f32 %v1052_v29, %v1896_v24  ;;  %v1006_v46 = vmax.f32 %v990_v32, %v1916_v30  ;;  %v1005_v50 = vmax.f32 %v989_v44, %v1915_v34  ;;  %v1200_v24 = vld [vmem:[%s2576_s6 + $0x40] sm:$0xff]  ;;  %v1202_v25 = vld [vmem:[%s2576_s6 + $0x50] sm:$0xff]  ;;  %v1207_v27 = vld [vmem:[%s2576_s6 + $0x78] sm:$0xff] }
 0x304   :  { %v1899_v35 = vpop.permute.xlu1 %1898  ;;  %v1919_v36 = vpop.permute.xlu0 %1918  ;;  %v1707_v28 = vpack.c.bf16 %v1202_v25, %v1200_v24  ;;  %v1709_v29 = vpack.c.bf16 %v1207_v27, %v1205_v26  ;;  %v1204_v30 = vld [vmem:[%s2576_s6 + $0x60] sm:$0xff]  ;;  %v1209_v32 = vld [vmem:[%s2576_s6 + $0x88] sm:$0xff]  ;;  %v1335_v27 = vld [vmem:[%s2578_s8 + $0xd0] sm:$0xff] }
 0x305   :  { %v1901_v41 = vunpack.i.h.bf16 %v1899_v35  ;;  %v1900_v42 = vunpack.i.l.bf16 %v1899_v35  ;;  %v1921_v43 = vunpack.i.h.bf16 %v1919_v36  ;;  %v1920_v45 = vunpack.i.l.bf16 %v1919_v36  ;;  %v1208_v36 = vld [vmem:[%s2576_s6 + $0x80] sm:$0xff]  ;;  %v1318_v26 = vld [vmem:[%s2578_s8 + $0x48] sm:$0xff] }
 0x306   :  { %v1711_v34 = vpack.c.bf16 %v1206_v31, %v1204_v30  ;;  %v1317_v25 = vld [vmem:[%s2578_s8 + $0x40] sm:$0xff]  ;;  %v1319_v31 = vld [vmem:[%s2578_s8 + $0x50] sm:$0xff] }
 0x307   :  { %v1083_v49 = vmax.f32 %v1067_v33, %v1900_v42  ;;  %v1084_v48 = vmax.f32 %v1068_v37, %v1901_v41  ;;  %v1022_v53 = vmax.f32 %v1006_v46, %v1921_v43  ;;  %v1021_v56 = vmax.f32 %v1005_v50, %v1920_v45  ;;  %v1211_v33 = vld [vmem:[%s2576_s6 + $0x98] sm:$0xff]  ;;  %v1210_v37 = vld [vmem:[%s2576_s6 + $0x90] sm:$0xff]  ;;  %v1213_v41 = vld [vmem:[%s2576_s6 + $0xa8] sm:$0xff] }
 0x308   :  { %v1929_v51 = vpop.permute.xlu1 %1928  ;;  %v1924_v39 = vpop.permute.xlu0 %1923  ;;  %v1713_v35 = vpack.c.bf16 %v1211_v33, %v1209_v32  ;;  %v1215_v42 = vld [vmem:[%s2576_s6 + $0xb8] sm:$0xff]  ;;  %v1715_v43 = vpack.c.bf16 %v1210_v37, %v1208_v36  ;;  %v1212_v45 = vld [vmem:[%s2576_s6 + $0xa0] sm:$0xff]  ;;  %v1214_v46 = vld [vmem:[%s2576_s6 + $0xb0] sm:$0xff] }
 0x309   :  { %v1690_v52 = vpack.c.bf16 %v1084_v48, %v1083_v49  ;;  %v1926_v55 = vunpack.i.h.bf16 %v1924_v39  ;;  %v1925_v57 = vunpack.i.l.bf16 %v1924_v39  ;;  %v1931_v59 = vunpack.i.h.bf16 %v1929_v51  ;;  %v1217_v49 = vld [vmem:[%s2576_s6 + $0xc8] sm:$0xff]  ;;  %v1219_v48 = vld [vmem:[%s2576_s6 + $0xd8] sm:$0xff]  ;;  %v1216_v39 = vld [vmem:[%s2576_s6 + $0xc0] sm:$0xff] }
 0x30a   :  { %v1930_v61 = vunpack.i.l.bf16 %v1929_v51  ;;  %v1717_v44 = vpack.c.bf16 %v1215_v42, %v1213_v41  ;;  %v1719_v50 = vpack.c.bf16 %v1214_v46, %v1212_v45  ;;  %v1721_v51 = vpack.c.bf16 %v1219_v48, %v1217_v49  ;;  %v1320_v32 = vld [vmem:[%s2578_s8 + $0x58] sm:$0xff]  ;;  %v1337_v33 = vld [vmem:[%s2578_s8 + $0xe0] sm:$0xff]  ;;  %v1322_v49 = vld [vmem:[%s2578_s8 + $0x68] sm:$0xff] }
 0x30b   :  { %v1038_v58 = vmax.f32 %v1022_v53, %v1926_v55  ;;  %1692 = vmatpush3.bf16.xpose.msk.msra.mxu0 %vm2346_vm7, %v1690_v52  ;;  %v1037_v62 = vmax.f32 %v1021_v56, %v1925_v57  ;;  %v1723_v52 = vpack.c.bf16 %v1218_v47, %v1216_v39  ;;  %v1221_v53 = vld [vmem:[%s2576_s6 + $0xe8] sm:$0xff]  ;;  %v1223_v55 = vld [vmem:[%s2576_s6 + $0xf8] sm:$0xff]  ;;  %v1220_v57 = vld [vmem:[%s2576_s6 + $0xe0] sm:$0xff] }
 0x30c   :  { %v1934_v63 = vpop.permute.xlu0 %1933  ;;  %1693 = vmatprep.subr.bf16.mxu0 %v1981_v54  ;;  %v1939_v0 = vpop.permute.xlu1 %1938  ;;  %v1193_v54 = vld [vmem:[%s2576_s6 + $0x8] sm:$0xff]  ;;  %v1725_v56 = vpack.c.bf16 %v1223_v55, %v1221_v53  ;;  %v1321_v46 = vld [vmem:[%s2578_s8 + $0x60] sm:$0xff]  ;;  %v1323_v47 = vld [vmem:[%s2578_s8 + $0x70] sm:$0xff]  ;;  %v1226_v55 = vlaneseq }
 0x30d   :  { %v1936_v38 = vunpack.i.h.bf16 %v1934_v63  ;;  %v1935_v40 = vunpack.i.l.bf16 %v1934_v63  ;;  %v1053_v1 = vmax.f32 %v1037_v62, %v1930_v61  ;;  %v1054_v2 = vmax.f32 %v1038_v58, %v1931_v59  ;;  %v1222_v58 = vld [vmem:[%s2576_s6 + $0xf0] sm:$0xff]  ;;  %v1325_v61 = vld [vmem:[%s2578_s8 + $0x80] sm:$0xff]  ;;  %v1326_v62 = vld [vmem:[%s2578_s8 + $0x88] sm:$0xff] }
 0x30e   :  { %v1941_v3 = vunpack.i.h.bf16 %v1939_v0  ;;  %v1940_v4 = vunpack.i.l.bf16 %v1939_v0  ;;  %v1697_v12 = vpack.c.bf16 %v1195_v60, %v1193_v54  ;;  %v1727_v59 = vpack.c.bf16 %v1222_v58, %v1220_v57  ;;  %v1309_v63 = vld [vmem:[%s2578_s8] sm:$0xff] }
 0x30f   :  { %v1069_v7 = vmax.f32 %v1053_v1, %v1935_v40  ;;  %v1070_v5 = vmax.f32 %v1054_v2, %v1936_v38  ;;  %v1729_v0 = vpack.c.bf16 %v1326_v62, %v1325_v61  ;;  %v1310_v38 = vld [vmem:[%s2578_s8 + $0x8] sm:$0xff]  ;;  %v1327_v40 = vld [vmem:[%s2578_s8 + $0x90] sm:$0xff]  ;;  %v1328_v1 = vld [vmem:[%s2578_s8 + $0x98] sm:$0xff]  ;;  %v1755_v48 = vpack.c.bf16 %v1322_v49, %v1321_v46 }
 0x310   :  { %1698 = vmatprep.subr.bf16.mxu1 %v1697_v12  ;;  %v1731_v2 = vpack.c.bf16 %v1310_v38, %v1309_v63  ;;  %v1313_v12 = vld [vmem:[%s2578_s8 + $0x20] sm:$0xff] }
 0x311   :  { %v1085_v6 = vmax.f32 %v1069_v7, %v1940_v4  ;;  %v1086_v8 = vmax.f32 %v1070_v5, %v1941_v3  ;;  %1700 = vmatpush1.bf16.msra.mxu1 %v1699_v16  ;;  %v1733_v3 = vpack.c.bf16 %v1328_v1, %v1327_v40  ;;  %v1311_v4 = vld [vmem:[%s2578_s8 + $0x10] sm:$0xff]  ;;  %v1312_v7 = vld [vmem:[%s2578_s8 + $0x18] sm:$0xff]  ;;  %v1329_v5 = vld [vmem:[%s2578_s8 + $0xa0] sm:$0xff]  ;;  %v1739_v16 = vpack.c.bf16 %v1314_v13, %v1313_v12 }
 0x312   :  { %1702 = vmatprep.subr.bf16.mxu1 %v1701_v17  ;;  %v1224_v58 = vld [vmem:[%s2577_s7] sm:$0x3]  ;;  %s1986_s7 = smov [#allocation2]  }
 0x313   :  { %v1694_v9 = vpack.c.bf16 %v1086_v8, %v1085_v6  ;;  %v1330_v6 = vld [vmem:[%s2578_s8 + $0xa8] sm:$0xff]  ;;  %s1439_s24 = sshll.u32 %s1986_s7, 4  ;;  %s1440_s24 = int_to_ptr.vmem [resolvable:$true] %s1439_s24 }
 0x314   :  { %v1737_v11 = vpack.c.bf16 %v1330_v6, %v1329_v5  ;;  %p1951_p1 = scmp.lt.s32.totalorder %s1440_s24, %s1440_s24 }
 0x315   :  { %1696 = vmatpush3.bf16.xpose.msk.msra.mxu0 %vm2346_vm7, %v1694_v9  ;;  %1704 = vmatpush1.bf16.msra.mxu1 %v1703_v22  ;;  %v1735_v9 = vpack.c.bf16 %v1312_v7, %v1311_v4  ;;  %v1334_v22 = vld [vmem:[%s2578_s8 + $0xc8] sm:$0xff]  ;;  %v1485_v4 = vld [vmem:[%s2579_s9] ss:$0 sm:$0xff]  ;;  %s1946_s9 = scalar_lea.vmem %s1440_s24, 32 }
 0x316   :  { %1706 = vmatprep.subr.bf16.mxu1 %v1705_v23  ;;  %1730 = vmatprep.subr.bf16.mxu0 %v1729_v0  ;;  %v1743_v23 = vpack.c.bf16 %v1316_v20, %v1315_v19  ;;  %v1745_v24 = vpack.c.bf16 %v1334_v22, %v1333_v21  ;;  %p1947_p0 = scmp.ne.s32.totalorder %s1440_s24, %s1946_s9  ;;  %p1952_p2 = scmp.lt.s32.totalorder %s1946_s9, %s1946_s9 }
 0x318   :  { %p1953_p3 = por %p1952_p2, %p1951_p1 }
 0x319   :  { %1708 = vmatpush1.bf16.msra.mxu1 %v1707_v28  ;;  %v1336_v28 = vld [vmem:[%s2578_s8 + $0xd8] sm:$0xff] }
 0x31a   :  { %1710 = vmatprep.subr.bf16.mxu1 %v1709_v29  ;;  %v1747_v29 = vpack.c.bf16 %v1318_v26, %v1317_v25  ;;  %v1749_v30 = vpack.c.bf16 %v1336_v28, %v1335_v27  ;;  %p1954_p4 = pnand %p1953_p3, %p1947_p0 }
 0x31c   :  { %1617 = vmatmul.mubr.msk.f32.vlgmr.msra.gmra.mrb[22].mxu0 %vm1088_vm6, %v1087_v10 }
 0x31d   :  { %1712 = vmatpush1.bf16.msra.mxu1 %v1711_v34  ;;  %1732 = vmatpush3.bf16.msra.mxu0 %v1731_v2  ;;  %v1338_v34 = vld [vmem:[%s2578_s8 + $0xe8] sm:$0xff] }
 0x31e   :  { %1714 = vmatprep.subr.bf16.mxu1 %v1713_v35  ;;  %1734 = vmatprep.subr.bf16.mxu0 %v1733_v3  ;;  %v1751_v35 = vpack.c.bf16 %v1320_v32, %v1319_v31  ;;  %v1753_v36 = vpack.c.bf16 %v1338_v34, %v1337_v33 }
 0x321   :  { %1716 = vmatpush1.bf16.msra.mxu1 %v1715_v43  ;;  %1736 = vmatpush3.bf16.msra.mxu0 %v1735_v9 }
 0x322   :  { %1718 = vmatprep.subr.bf16.mxu1 %v1717_v44  ;;  %1738 = vmatprep.subr.bf16.mxu0 %v1737_v11 }
 0x325   :  { %1720 = vmatpush1.bf16.msra.mxu1 %v1719_v50  ;;  %1740 = vmatpush3.bf16.msra.mxu0 %v1739_v16  ;;  %v1339_v50 = vld [vmem:[%s2578_s8 + $0xf0] sm:$0xff] }
 0x326   :  { %1722 = vmatprep.subr.bf16.mxu1 %v1721_v51  ;;  %1742 = vmatprep.subr.bf16.mxu0 %v1741_v18  ;;  %v1340_v51 = vld [vmem:[%s2578_s8 + $0xf8] sm:$0xff] }
 0x327   :  { %v1757_v39 = vpack.c.bf16 %v1340_v51, %v1339_v50 }
 0x329   :  { %1724 = vmatpush1.bf16.msra.mxu1 %v1723_v52  ;;  %1744 = vmatpush3.bf16.msra.mxu0 %v1743_v23  ;;  %v1324_v52 = vld [vmem:[%s2578_s8 + $0x78] sm:$0xff] }
 0x32a   :  { %1726 = vmatprep.subr.bf16.mxu1 %v1725_v56  ;;  %1746 = vmatprep.subr.bf16.mxu0 %v1745_v24  ;;  %v1759_v53 = vpack.c.bf16 %v1324_v52, %v1323_v47  ;;  %v1227_v56 = vshrl.u32 %v1226_v55, 7 }
 0x32c   :  { %v1228_v57 = vsub.s32 0, %v1227_v56 }
 0x32d   :  { %1728 = vmatpush1.bf16.msra.mxu1 %v1727_v59  ;;  %1748 = vmatpush3.bf16.msra.mxu0 %v1747_v29  ;;  %v1232_v59 = vsub.s32 1, %v1227_v56 }
 0x32e   :  { %1750 = vmatprep.subr.bf16.mxu0 %v1749_v30  ;;  %v1229_v61 = vrot.slane %v1224_v58, %v1228_v57 }
 0x32f   :  { %v1233_v62 = vrot.slane %v1224_v58, %v1232_v59 }
 0x331   :  { %1752 = vmatpush3.bf16.msra.mxu0 %v1751_v35 }
 0x332   :  { %1754 = vmatprep.subr.bf16.mxu0 %v1753_v36 }
 0x335   :  { %1756 = vmatpush3.bf16.msra.mxu0 %v1755_v48 }
 0x336   :  { %1758 = vmatprep.subr.bf16.mxu0 %v1757_v39 }
 0x339   :  { %1760 = vmatpush3.bf16.msra.mxu0 %v1759_v53 }
 0x3ef   :  { %v1170_v8 = vpop.f32.mrb[22].mxu0 }
 0x3f0   :  { %v1618_v10 = vpop.f32.mrb[23].mxu0  ;;  %v1175_v54 = vrot.slane %v1170_v8, 2  ;;  %v1179_v60 = vrot.slane %v1170_v8, 4  ;;  %v1183_v17 = vrot.slane %v1170_v8, 6 }
 0x3f2   :  { %1176 = vrot.lane.b32.xlu0 %v1175_v54, %s1983_s0  ;;  %1180 = vrot.lane.b32.xlu1 %v1179_v60, %s1984_s15 }
 0x3f6   :  { %1184 = vrot.lane.b32.xlu0 %v1183_v17, %s1985_s22 }
 0x464   :  { %v1177_v37 = vpop.permute.xlu0 %1176  ;;  %v1181_v42 = vpop.permute.xlu1 %1180 }
 0x465   :  { %v1187_v41 = vsel %vm768_vm4, %v1170_v8, %v1177_v37 }
 0x466   :  { %v1189_v43 = vsel %vm1188_vm8, %v1187_v41, %v1181_v42 }
 0x468   :  { %v1185_v44 = vpop.permute.xlu0 %1184 }
 0x469   :  { %v1191_v45 = vsel %vm1190_vm9, %v1189_v43, %v1185_v44 }
 0x46a   :  { %1301 = vmatmul.mubr.f32.vlgmr.msra.gmra.mrb[26].mxu1 %v1191_v45 }
 0x53d   :  { %v1302_v63 = vpop.f32.mrb[26].mxu1 }
 0x53e   :  { %v1303_v0 = vadd.f32 %v1302_v63, %v1229_v61  ;;  %v1304_v38 = vpop.f32.mrb[27].mxu1 }
 0x53f   :  { %v1305_v40 = vadd.f32 %v1304_v38, %v1233_v62 }
 0x540   :  { %v1307_v2 = vmax.f32 %v1303_v0, 0.0 }
 0x541   :  { %v1308_v1 = vmax.f32 %v1305_v40, 0.0 }
 0x543   :  { %1412 = vmatprep.mubr.f32.mxu0 %v1308_v1 }
 0x544   :  { %1413 = vmatmul.mubr.f32.vlgmr.msra.gmra.mrb[24].mxu0 %v1307_v2 }
 0x617   :  { %v1581_v3 = vpop.f32.mrb[24].mxu0 }
 0x618   :  { %v1582_v7 = vpop.f32.mrb[25].mxu0 }
 0x619   :  { %v1583_v5 = vadd.f32 %v1582_v7, %v1581_v3 }
 0x61b   :  { %v1415_v6 = vadd.f32 %v1583_v5, %v1485_v4 }
 0x61d   :  { %v1419_v8 = vsel %vm1418_vm10, %v1415_v6, -inf }
 0x61e   :  { %1420 = vmax.xlane.f32.xlu1 %v1419_v8 }
 0x6ab   :  { %v1421_v9 = vpop.xlane.xlu1 %1420 }
 0x6ac   :  { %v1422_v10 = vsub.f32 %v1415_v6, %v1421_v9 }
 0x6ae   :  { %v1423_v54 = vmul.f32 1.442695, %v1422_v10 }
 0x6b0   :  { %1942 = vpow2.f32 %v1423_v54 }
 0x6ba   :  { %v1943_v60 = vpop.eup %1942 }
 0x6bb   :  { %v1425_v11 = vsel %vm1418_vm10, %v1943_v60, 0.0 }
 0x6bc   :  { %1426 = vadd.xlane.f32.xlu0 %v1425_v11 }
 0x749   :  { %v1427_v12 = vpop.xlane.xlu0 %1426 }
 0x74a   :  { %1944 = vlog2.f32 %v1427_v12 }
 0x754   :  { %v1945_v13 = vpop.eup %1944 }
 0x755   :  { %v1429_v14 = vmul.f32 0.6931472, %v1945_v13 }
 0x757   :  { %v1430_v15 = vadd.f32 %v1429_v14, %v1421_v9 }
 0x759   :  { %v1431_v16 = vsub.f32 %v1415_v6, %v1430_v15 }
 0x75b   :  { %1432 = vst [vmem:[#allocation2] sm:$0x3] %v1431_v16 }
 0x75c   :  { %1957 = shalt.err (!%p1954_p4)
}
 0x75d   :  { %s1958_s27 = scalar_lea.hbm %s2580_s10, 32 }
 0x75e   :  { %p1959_p5 = scmp.ne.s32.totalorder %s2580_s10, %s1958_s27  ;;  %p1962_p6 = scmp.lt.u32.totalorder %s1958_s27, %s2580_s10 }
 0x760   :  { %p1964_p7 = pnand %p1962_p6, %p1959_p5 }
 0x762   :  { %1967 = shalt.err (!%p1964_p7)
}
 0x763   :  { %1442 = dma.vmem_to_hbm [thread:$0]  %s1440_s24, 32, %s2580_s10, [#allocation3]  }
 0x764   :  { %1968 = dma.done.wait [#allocation3], 32  }
 0x765   :  { %1969 = vsyncadd [#allocation3], 4294967264 }
 0x766   :  { %1446 = vsyncpa [#allocation3], 1 }

</bundles_post_ra>
